<compile_context>
chip_gen: v6e
topology: v6e:2x2x1
jax: 0.10.0
libtpu: 0.0.40
codegen_flags: <defaults>
</compile_context>

<pallas_src>
import jax
import jax.numpy as jnp
from jax.experimental import pallas as pl
from jax.experimental.pallas import tpu as pltpu

_LANE = 128


def _resolve_shape(shape, total):
    """Resolve a torch-style view shape (with at most one -1) against total."""
    shape = tuple(int(s) for s in shape)
    if shape.count(-1) > 1:
        raise ValueError(f"only one dimension can be inferred: {shape}")
    if -1 in shape:
        known = 1
        for s in shape:
            if s != -1:
                known *= s
        if known == 0 or total % known != 0:
            raise ValueError(f"cannot view {total} elements as {shape}")
        shape = tuple(total // known if s == -1 else s for s in shape)
    prod = 1
    for s in shape:
        prod *= s
    if prod != total:
        raise ValueError(f"cannot view {total} elements as {shape}")
    return shape


def _copy_kernel(x_ref, o_ref):
    # Straight VMEM tile copy (pure DMA/VPU, no dtype round-trips).
    o_ref[...] = x_ref[...]


def _pick_block_rows(rows):
    """Largest divisor of `rows` that is a multiple of 8 and <= 1024.

    Keeps blocks lane-dense and big (per v6e guidance) while staying well
    under the 64 MiB per-TC VMEM budget on v7x even with double-buffering
    (1024 x 128 x 4 B = 512 KiB per block).
    """
    for cand in range(min(rows, 1024), 7, -1):
        if cand % 8 == 0 and rows % cand == 0:
            return cand
    return rows  # full-extent block (always legal)


def pallas_materialize_view(x, shape):
    """Explicit materializing view: copies x into a fresh buffer of `shape`.

    Only use this when a new buffer is actually required; the zero-cost path
    is `View` below (plain jnp.reshape).
    """
    total = int(x.size)
    out_shape = _resolve_shape(shape, total)
    itemsize = jnp.dtype(x.dtype).itemsize

    if total % _LANE == 0:
        rows = total // _LANE
        flat = jnp.reshape(x, (rows, _LANE))
        block_rows = _pick_block_rows(rows)
        grid = (rows // block_rows,)
        out = pl.pallas_call(
            _copy_kernel,
            out_shape=jax.ShapeDtypeStruct((rows, _LANE), x.dtype),
            grid=grid,
            in_specs=[pl.BlockSpec((block_rows, _LANE), lambda i: (i, 0))],
            out_specs=pl.BlockSpec((block_rows, _LANE), lambda i: (i, 0)),
            compiler_params=pltpu.CompilerParams(
                dimension_semantics=("parallel",)),
            cost_estimate=pl.CostEstimate(
                flops=0, transcendentals=0,
                bytes_accessed=2 * total * itemsize),
        )(flat)
    else:
        # Irregular total: single full-array block (always a legal block shape).
        flat = jnp.reshape(x, (1, total))
        out = pl.pallas_call(
            _copy_kernel,
            out_shape=jax.ShapeDtypeStruct((1, total), x.dtype),
            cost_estimate=pl.CostEstimate(
                flops=0, transcendentals=0,
                bytes_accessed=2 * total * itemsize),
        )(flat)

    return jnp.reshape(out, out_shape)


class View:
    """JAX equivalent of the PyTorch View module (torch x.view(*shape)).

    A contiguous C-order view is pure metadata, so no Pallas kernel (and no
    HBM traffic) is involved: jnp.reshape is a zero-cost bitcast in XLA and
    fuses freely with producers/consumers.
    """

    def __init__(self, shape):
        self.shape = tuple(shape)

    def __call__(self, x):
        return jnp.reshape(x, self.shape)


if __name__ == "__main__":
    key = jax.random.PRNGKey(0)
    # NCHW input, small shapes: batch=2, channels=4, spatial=16x16
    x = jax.random.normal(key, (2, 4, 16, 16), dtype=jnp.float32)

    expected = jnp.reshape(x, (2, -1))

    # Typical RegretNet usage: flatten trailing dims, e.g. View((2, -1)).
    view = View((2, -1))
    y = view(x)
    jax.block_until_ready(y)
    assert y.shape == expected.shape, (y.shape, expected.shape)
    assert y.dtype == expected.dtype
    assert bool(jnp.array_equal(y, expected))

    # Exercise the explicit Pallas materializing fallback path once as well.
    y_pallas = pallas_materialize_view(x, (2, -1))
    jax.block_until_ready(y_pallas)
    assert y_pallas.shape == expected.shape, (y_pallas.shape, expected.shape)
    assert y_pallas.dtype == expected.dtype
    assert bool(jnp.array_equal(y_pallas, expected))

    print("KERNEL_OK")
</pallas_src>

<mosaic_0001>
module attributes {stable_mosaic.version = 11 : i64} {
  func.func @_copy_kernel(%arg0: i32, %arg1: memref<16x128xf32, #tpu.memory_space<vmem>>, %arg2: memref<16x128xf32, #tpu.memory_space<vmem>>) attributes {dimension_semantics = [#tpu.dimension_semantics<parallel>], iteration_bounds = array<i64: 1>, scalar_prefetch = 0 : i64, scratch_operands = 0 : i64, tpu.core_type = #tpu.core_type<tc>, window_params = [{transform_indices = @transform_0, window_bounds = array<i64: 16, 128>}, {transform_indices = @transform_1, window_bounds = array<i64: 16, 128>}]} {
    %c0 = arith.constant 0 : index
    %c0_0 = arith.constant 0 : index
    %0 = vector.load %arg1[%c0, %c0_0] : memref<16x128xf32, #tpu.memory_space<vmem>>, vector<16x128xf32>
    %c0_1 = arith.constant 0 : index
    %c0_2 = arith.constant 0 : index
    %1 = vector.load %arg2[%c0_1, %c0_2] : memref<16x128xf32, #tpu.memory_space<vmem>>, vector<16x128xf32>
    tpu.vector_store %arg2[%c0_1, %c0_2], %0 {strides = array<i32>} : memref<16x128xf32, #tpu.memory_space<vmem>>, vector<16x128xf32>,
    return
  }
  func.func @transform_0(%arg0: i32) -> (i32, i32) {
    %c0_i32 = arith.constant 0 : i32
    %c0_i32_0 = arith.constant 0 : i32
    return %arg0, %c0_i32 : i32, i32
  }
  func.func @transform_1(%arg0: i32) -> (i32, i32) {
    %c0_i32 = arith.constant 0 : i32
    %c0_i32_0 = arith.constant 0 : i32
    return %arg0, %c0_i32 : i32, i32
  }
}

</mosaic_0001>

<bundles_post_ra>
// kernel: tpu_custom_call.1
= control target key start
LH: loop header
LB: loop body
LE: loop exit
PB: predicated region body
PF: predicated region fallthrough
CT: control target
= control target key end

     0   :  { %6 = vsyncpa [#allocation3], 0  ;;  %s112_s0 = inlined_call_operand.hbm [shape: f32[16,128], index: 0, kind: input, shape index: {}]   ;;  %s113_s1 = inlined_call_operand.hbm [shape: f32[16,128], index: 1, kind: output, shape index: {}]  }
   0x1   :  { %7 = vsyncpa [#allocation4], 0  ;;  %s92_s6 = smov [#allocation2]  }
   0x2   :  { %s13_s7 = sshll.u32 %s92_s6, 4  ;;  %s14_s7 = int_to_ptr.vmem [resolvable:$true] %s13_s7 }
   0x3   :  { %s56_s8 = scalar_lea.vmem %s14_s7, 256  ;;  %p61_p1 = scmp.lt.s32.totalorder %s14_s7, %s14_s7 }
   0x4   :  { %p57_p0 = scmp.ne.s32.totalorder %s14_s7, %s56_s8  ;;  %p62_p2 = scmp.lt.s32.totalorder %s56_s8, %s56_s8 }
   0x6   :  { %p63_p3 = por %p62_p2, %p61_p1 }
   0x8   :  { %p64_p4 = pnand %p63_p3, %p57_p0 }
   0xa   :  { %67 = shalt.err (!%p64_p4)
}
   0xb   :  { %s93_s9 = smov 128   ;;  %s94_s10 = smov 8  }
   0xc   :  { %19 = dma.hbm_to_vmem [thread:$0]  %s112_s0, 256, %s14_s7, [#allocation3], %s93_s9, %s93_s9, %s94_s10  }
   0xd   :  { %88 = dma.done.wait [#allocation3], 256  }
   0xe   :  { %89 = vsyncadd [#allocation3], 4294967040  ;;  %s95_s13 = smov [#allocation5]   ;;  %v23_v0 = vld [vmem:[#allocation2] sm:$0xff]  ;;  %v24_v1 = vld [vmem:[#allocation2 + $0x8] sm:$0xff] }
   0xf   :  { %s32_s14 = sshll.u32 %s95_s13, 4  ;;  %25 = vst [vmem:[#allocation5] sm:$0xff] %v23_v0  ;;  %26 = vst [vmem:[#allocation5 + $0x8] sm:$0xff] %v24_v1  ;;  %s33_s14 = int_to_ptr.vmem [resolvable:$true] %s32_s14 }
  0x10   :  { %s68_s15 = scalar_lea.vmem %s33_s14, 256  ;;  %p73_p6 = scmp.lt.s32.totalorder %s33_s14, %s33_s14 }
  0x11   :  { %p69_p5 = scmp.ne.s32.totalorder %s33_s14, %s68_s15  ;;  %p74_p7 = scmp.lt.s32.totalorder %s68_s15, %s68_s15 }
  0x13   :  { %p75_p8 = por %p74_p7, %p73_p6 }
  0x15   :  { %p76_p9 = pnand %p75_p8, %p69_p5 }
  0x17   :  { %79 = shalt.err (!%p76_p9)
}
  0x18   :  { %38 = dma.vmem_to_hbm [thread:$0]  %s33_s14, 256, %s113_s1, [#allocation4], %s93_s9, %s93_s9, %s94_s10  }
  0x19   :  { %90 = dma.done.wait [#allocation4], 256  }
  0x1a   :  { %91 = vsyncadd [#allocation4], 4294967040 }
  0x1b   :  { %42 = vsyncpa [#allocation3], 1 }
  0x1c   :  { %43 = vsyncpa [#allocation4], 1 }

</bundles_post_ra>
